<compile_context>
chip_gen: v5e
topology: v5e:2x2
jax: 0.10.0
libtpu: 0.0.40
codegen_flags: <defaults>
</compile_context>

<pallas_src>
import functools

import jax
import jax.numpy as jnp
from jax.experimental import pallas as pl
from jax.experimental.pallas import tpu as pltpu

_LANES = 128
_SUBLANES = 8


def _cls_head_kernel(x_ref, w1_ref, b1_ref, w2_ref, b2_ref, o_ref, *, bf16_tanh):
    # x_ref:  [TB, D]      f32   CLS-token rows
    # w1_ref: [D, inner]   bf16  dense weight, pre-transposed to [in, out]
    # b1_ref: [1, inner]   f32
    # w2_ref: [inner, Cp]  bf16  out_proj weight, pre-transposed + lane-padded
    # b2_ref: [1, Cp]      f32   (zero padded)
    # o_ref:  [TB, Cp]     f32
    x = x_ref[...].astype(jnp.bfloat16)

    # dense: x @ W1 on the MXU, f32 accumulation; plain jnp.dot, no relayout.
    h = jnp.dot(x, w1_ref[...], preferred_element_type=jnp.float32) + b1_ref[...]

    if bf16_tanh:
        # v6e/v7x: bf16 EUP tanh; result already in the dtype the MXU wants.
        h = jnp.tanh(h.astype(jnp.bfloat16))
    else:
        # v5e: no bf16 EUP -- keep tanh in f32, then cast for the MXU.
        h = jnp.tanh(h).astype(jnp.bfloat16)

    # dropout: identity at inference  # TODO(synk): training-mode dropout omitted

    out = jnp.dot(h, w2_ref[...], preferred_element_type=jnp.float32) + b2_ref[...]
    o_ref[...] = out.astype(o_ref.dtype)


def _round_up(x, m):
    return ((x + m - 1) // m) * m


def _pick_tb(batch, d, inner, cp):
    """Batch tile: multiple of 8, VMEM-budgeted, and >= 2 grid steps when possible."""
    if batch <= _SUBLANES:
        return batch  # single block equal to the full (tiny) batch dim
    # Per-row VMEM cost of the batch-tiled traffic: x (f32, double-buffered),
    # out (f32, double-buffered), plus in-kernel h temporaries (f32 + bf16).
    per_row = 2 * d * 4 + 2 * cp * 4 + inner * (4 + 2)
    budget = 24 * 1024 * 1024          # stay well inside the 32 MiB scoped default
    cap = max(_SUBLANES, min(1024, (budget // per_row) // _SUBLANES * _SUBLANES))
    # Guarantee >= 2 grid steps so both v7x TensorCores get work on the
    # "parallel" batch axis; on single-TC chips the extra step is ~0.35 us.
    half = _round_up(-(-batch // 2), _SUBLANES)
    return max(_SUBLANES, min(cap, half))


def _const_block_spec(shape):
    """Constant-index block (weights/biases): fetched once; single-buffered."""
    try:
        return pl.BlockSpec(shape, lambda i: (0, 0), pipeline_mode=pl.Buffered(1))
    except Exception:  # fallback if pipeline_mode/Buffered unavailable
        return pl.BlockSpec(shape, lambda i: (0, 0))


def roberta_classification_head(features, w_dense, b_dense, w_out, b_out,
                                *, cls_preslice_min_d=512):
    """features: [B, T, D]; nn.Linear weights are [out, in].  Returns [B, C] f32."""
    B, _, D = features.shape
    inner = w_dense.shape[0]
    C = w_out.shape[0]
    Cp = max(_LANES, _round_up(C, _LANES))   # lane-dense output -> unmasked stores

    # Weights pre-transposed ONCE (constant params, free) to [in, out]; bf16
    # halves the HBM->VMEM DMA bytes, accumulation stays f32 on the MXU.
    w1t = w_dense.T.astype(jnp.bfloat16)                               # [D, inner]
    w2t = jnp.zeros((inner, Cp), jnp.bfloat16).at[:, :C].set(
        w_out.T.astype(jnp.bfloat16))                                  # [inner, Cp]
    b1 = b_dense.astype(jnp.float32).reshape(1, inner)                 # [1, inner]
    b2 = jnp.zeros((1, Cp), jnp.float32).at[0, :C].set(
        b_out.astype(jnp.float32))                                     # [1, Cp]

    tb = _pick_tb(B, D, inner, Cp)
    grid = (pl.cdiv(B, tb),)   # ragged last batch block handled by Pallas masking

    # bf16 tanh on v6e/v7x (bf16 EUP); f32 tanh on v5e (no bf16 EUP).
    try:
        kind = jax.devices()[0].device_kind.lower()
    except Exception:
        kind = ""
    bf16_tanh = "v5" not in kind

    if D < cls_preslice_min_d:
        # Narrow hidden size: per-row strided DMA would be descriptor-bound;
        # one XLA gather in the wrapper gives the kernel a contiguous slab.
        x_in = features[:, 0, :]                                       # [B, D]
        x_spec = pl.BlockSpec((tb, D), lambda i: (i, 0))
    else:
        # Wide hidden size: fold the CLS slice into the BlockSpec (squeezed T);
        # each row is a multi-KiB contiguous chunk, no [B, D] staging in HBM.
        x_in = features
        x_spec = pl.BlockSpec((tb, None, D), lambda i: (i, 0, 0))

    w_specs = [
        _const_block_spec((D, inner)),
        _const_block_spec((1, inner)),
        _const_block_spec((inner, Cp)),
        _const_block_spec((1, Cp)),
    ]

    cost = pl.CostEstimate(
        flops=int(2 * B * D * inner + 2 * B * inner * Cp),
        transcendentals=int(B * inner),
        bytes_accessed=int(B * D * features.dtype.itemsize
                           + w1t.size * 2 + w2t.size * 2
                           + b1.size * 4 + b2.size * 4
                           + B * Cp * 4),
    )

    out_padded = pl.pallas_call(
        functools.partial(_cls_head_kernel, bf16_tanh=bf16_tanh),
        out_shape=jax.ShapeDtypeStruct((B, Cp), jnp.float32),
        grid=grid,
        in_specs=[x_spec] + w_specs,
        out_specs=pl.BlockSpec((tb, Cp), lambda i: (i, 0)),
        compiler_params=pltpu.CompilerParams(
            dimension_semantics=("parallel",),   # batch tiles -> megacore on v7x
        ),
        cost_estimate=cost,
    )(x_in, w1t, b1, w2t, b2)

    return out_padded[:, :C]


def _ref_head(features, w_dense, b_dense, w_out, b_out):
    x = features[:, 0, :]
    return jnp.tanh(x @ w_dense.T + b_dense) @ w_out.T + b_out


if __name__ == "__main__":
    key = jax.random.PRNGKey(0)

    def make_case(k, B, T, D, inner, C):
        ks = jax.random.split(k, 5)
        features = jax.random.normal(ks[0], (B, T, D), dtype=jnp.float32)
        w_dense = jax.random.normal(ks[1], (inner, D), dtype=jnp.float32) * 0.05
        b_dense = jax.random.normal(ks[2], (inner,), dtype=jnp.float32) * 0.05
        w_out = jax.random.normal(ks[3], (C, inner), dtype=jnp.float32) * 0.05
        b_out = jax.random.normal(ks[4], (C,), dtype=jnp.float32) * 0.05
        return features, w_dense, b_dense, w_out, b_out

    k1, k2 = jax.random.split(key, 2)

    # Case 1: toy module shapes (pre-sliced contiguous CLS path, single block).
    args = make_case(k1, B=2, T=8, D=32, inner=32, C=4)
    out = jax.block_until_ready(roberta_classification_head(*args))
    ref = _ref_head(*args)
    assert out.shape == (2, 4)
    assert jnp.allclose(out, ref, atol=1e-2, rtol=1e-2), (
        f"case1 max abs err {jnp.max(jnp.abs(out - ref))}")

    # Case 2: same shapes via the squeezed-T BlockSpec path (wide-D code path).
    out = jax.block_until_ready(
        roberta_classification_head(*args, cls_preslice_min_d=0))
    assert jnp.allclose(out, ref, atol=1e-2, rtol=1e-2), (
        f"case2 max abs err {jnp.max(jnp.abs(out - ref))}")

    # Case 3: multi-step grid with a ragged last batch block (B=20 -> tb=16).
    args = make_case(k2, B=20, T=8, D=32, inner=32, C=4)
    out = jax.block_until_ready(roberta_classification_head(*args))
    ref = _ref_head(*args)
    assert out.shape == (20, 4)
    assert jnp.allclose(out, ref, atol=1e-2, rtol=1e-2), (
        f"case3 max abs err {jnp.max(jnp.abs(out - ref))}")

    print("KERNEL_OK")
</pallas_src>

<mosaic_0001>
module attributes {stable_mosaic.version = 11 : i64} {
  func.func @_cls_head_kernel(%arg0: i32, %arg1: memref<2x32xf32, #tpu.memory_space<vmem>>, %arg2: memref<32x32xbf16, #tpu.memory_space<vmem>>, %arg3: memref<1x32xf32, #tpu.memory_space<vmem>>, %arg4: memref<32x128xbf16, #tpu.memory_space<vmem>>, %arg5: memref<1x128xf32, #tpu.memory_space<vmem>>, %arg6: memref<2x128xf32, #tpu.memory_space<vmem>>) attributes {dimension_semantics = [#tpu.dimension_semantics<parallel>], iteration_bounds = array<i64: 1>, scalar_prefetch = 0 : i64, scratch_operands = 0 : i64, tpu.core_type = #tpu.core_type<tc>, window_params = [{transform_indices = @transform_0, window_bounds = array<i64: 2, 32>}, {pipeline_mode = #tpu.pipeline_mode<synchronous>, transform_indices = @transform_1, window_bounds = array<i64: 32, 32>}, {pipeline_mode = #tpu.pipeline_mode<synchronous>, transform_indices = @transform_2, window_bounds = array<i64: 1, 32>}, {pipeline_mode = #tpu.pipeline_mode<synchronous>, transform_indices = @transform_3, window_bounds = array<i64: 32, 128>}, {pipeline_mode = #tpu.pipeline_mode<synchronous>, transform_indices = @transform_4, window_bounds = array<i64: 1, 128>}, {transform_indices = @transform_5, window_bounds = array<i64: 2, 128>}]} {
    %c0 = arith.constant 0 : index
    %c0_0 = arith.constant 0 : index
    %0 = vector.load %arg1[%c0, %c0_0] : memref<2x32xf32, #tpu.memory_space<vmem>>, vector<2x32xf32>
    %1 = arith.truncf %0 : vector<2x32xf32> to vector<2x32xbf16>
    %c0_1 = arith.constant 0 : index
    %c0_2 = arith.constant 0 : index
    %2 = vector.load %arg2[%c0_1, %c0_2] : memref<32x32xbf16, #tpu.memory_space<vmem>>, vector<32x32xbf16>
    %cst = arith.constant dense<0.000000e+00> : vector<2x32xf32>
    %3 = tpu.matmul %1, %2, %cst {dimension_numbers = #tpu.dot_dimension_numbers<[1], [0], [0], [1], [0, 0, 1, 1], [], []>} : vector<2x32xbf16>, vector<32x32xbf16>, vector<2x32xf32> -> vector<2x32xf32>
    %c0_3 = arith.constant 0 : index
    %c0_4 = arith.constant 0 : index
    %4 = vector.load %arg3[%c0_3, %c0_4] : memref<1x32xf32, #tpu.memory_space<vmem>>, vector<1x32xf32>
    %5 = vector.broadcast %4 : vector<1x32xf32> to vector<2x32xf32>
    %6 = arith.addf %3, %5 : vector<2x32xf32>
    %7 = arith.truncf %6 : vector<2x32xf32> to vector<2x32xbf16>
    %8 = math.tanh %7 : vector<2x32xbf16>
    %c0_5 = arith.constant 0 : index
    %c0_6 = arith.constant 0 : index
    %9 = vector.load %arg4[%c0_5, %c0_6] : memref<32x128xbf16, #tpu.memory_space<vmem>>, vector<32x128xbf16>
    %cst_7 = arith.constant dense<0.000000e+00> : vector<2x128xf32>
    %10 = tpu.matmul %8, %9, %cst_7 {dimension_numbers = #tpu.dot_dimension_numbers<[1], [0], [0], [1], [0, 0, 1, 1], [], []>} : vector<2x32xbf16>, vector<32x128xbf16>, vector<2x128xf32> -> vector<2x128xf32>
    %c0_8 = arith.constant 0 : index
    %c0_9 = arith.constant 0 : index
    %11 = vector.load %arg5[%c0_8, %c0_9] : memref<1x128xf32, #tpu.memory_space<vmem>>, vector<1x128xf32>
    %12 = vector.broadcast %11 : vector<1x128xf32> to vector<2x128xf32>
    %13 = arith.addf %10, %12 : vector<2x128xf32>
    %c0_10 = arith.constant 0 : index
    %c0_11 = arith.constant 0 : index
    %14 = vector.load %arg6[%c0_10, %c0_11] : memref<2x128xf32, #tpu.memory_space<vmem>>, vector<2x128xf32>
    tpu.vector_store %arg6[%c0_10, %c0_11], %13 {strides = array<i32>} : memref<2x128xf32, #tpu.memory_space<vmem>>, vector<2x128xf32>,
    return
  }
  func.func @transform_0(%arg0: i32) -> (i32, i32) {
    %c0_i32 = arith.constant 0 : i32
    %c0_i32_0 = arith.constant 0 : i32
    return %arg0, %c0_i32 : i32, i32
  }
  func.func @transform_1(%arg0: i32) -> (i32, i32) {
    %c0_i32 = arith.constant 0 : i32
    %c0_i32_0 = arith.constant 0 : i32
    %c0_i32_1 = arith.constant 0 : i32
    return %c0_i32, %c0_i32_0 : i32, i32
  }
  func.func @transform_2(%arg0: i32) -> (i32, i32) {
    %c0_i32 = arith.constant 0 : i32
    %c0_i32_0 = arith.constant 0 : i32
    %c0_i32_1 = arith.constant 0 : i32
    return %c0_i32, %c0_i32_0 : i32, i32
  }
  func.func @transform_3(%arg0: i32) -> (i32, i32) {
    %c0_i32 = arith.constant 0 : i32
    %c0_i32_0 = arith.constant 0 : i32
    %c0_i32_1 = arith.constant 0 : i32
    return %c0_i32, %c0_i32_0 : i32, i32
  }
  func.func @transform_4(%arg0: i32) -> (i32, i32) {
    %c0_i32 = arith.constant 0 : i32
    %c0_i32_0 = arith.constant 0 : i32
    %c0_i32_1 = arith.constant 0 : i32
    return %c0_i32, %c0_i32_0 : i32, i32
  }
  func.func @transform_5(%arg0: i32) -> (i32, i32) {
    %c0_i32 = arith.constant 0 : i32
    %c0_i32_0 = arith.constant 0 : i32
    return %arg0, %c0_i32 : i32, i32
  }
}

</mosaic_0001>

<bundles_post_ra>
// kernel: tpu_custom_call.1
= control target key start
LH: loop header
LB: loop body
LE: loop exit
PB: predicated region body
PF: predicated region fallthrough
CT: control target
= control target key end

     0   :  { %10 = vsyncpa [#allocation3], 0  ;;  %s353_s0 = inlined_call_operand.hbm [shape: f32[2,32], index: 0, kind: input, shape index: {}]   ;;  %s354_s1 = inlined_call_operand.hbm [shape: bf16[32,32], index: 1, kind: input, shape index: {}]   ;;  %s355_s2 = inlined_call_operand.vmem [shape: f32[1,32], index: 2, kind: input, shape index: {}]   ;;  %s356_s3 = inlined_call_operand.hbm [shape: bf16[32,128], index: 3, kind: input, shape index: {}]   ;;  %s357_s4 = inlined_call_operand.vmem [shape: f32[1,128], index: 4, kind: input, shape index: {}]   ;;  %s358_s5 = inlined_call_operand.hbm [shape: f32[2,128], index: 5, kind: output, shape index: {}]  }
   0x1   :  { %11 = vsyncpa [#allocation6], 0  ;;  %s28_s20 = sshll.u32 %s354_s1, 4  ;;  %s29_s20 = int_to_ptr.hbm [resolvable:$true] %s28_s20 }
   0x2   :  { %12 = vsyncpa [#allocation4], 0  ;;  %s299_s21 = smov [#allocation5]   ;;  %s18_s25 = sshll.u32 %s353_s0, 4  ;;  %s19_s25 = int_to_ptr.hbm [resolvable:$true] %s18_s25 }
   0x3   :  { %s30_s22 = sshll.u32 %s299_s21, 4  ;;  %s300_s26 = smov 64   ;;  %s31_s22 = int_to_ptr.vmem [resolvable:$true] %s30_s22 }
   0x4   :  { %s301_s27 = smov 4   ;;  %s302_s28 = smov [#allocation2]  }
   0x5   :  { %36 = dma.hbm_to_vmem [thread:$0]  %s29_s20, 256, %s31_s22, [#allocation6], %s300_s26, %s300_s26, %s301_s27  }
   0x6   :  { %s20_s29 = sshll.u32 %s302_s28, 4  ;;  %s43_s7 = sshll.u32 %s356_s3, 4  ;;  %s21_s29 = int_to_ptr.vmem [resolvable:$true] %s20_s29  ;;  %s44_s7 = int_to_ptr.hbm [resolvable:$true] %s43_s7 }
   0x7   :  { %23 = dma.hbm_to_vmem [thread:$0]  %s19_s25, 32, %s21_s29, [#allocation3]  }
   0x8   :  { %s303_s1 = smov [#allocation7]  }
   0x9   :  { %s45_s8 = sshll.u32 %s303_s1, 4  ;;  %s46_s8 = int_to_ptr.vmem [resolvable:$true] %s45_s8 }
   0xa   :  { %51 = dma.hbm_to_vmem [thread:$0]  %s44_s7, 256, %s46_s8, [#allocation6], %s300_s26, %s300_s26, %s301_s27  }
   0xb   :  { %293 = dma.done.wait [#allocation3], 32  }
   0xc   :  { %294 = vsyncadd [#allocation3], 4294967264 }
   0xd   :  { %295 = dma.done.wait [#allocation6], 512  }
   0xe   :  { %296 = vsyncadd [#allocation6], 4294966784  ;;  %v184_v0 = vld [vmem:[#allocation5 + $0x8] sm:$0xff]  ;;  %v183_v1 = vld [vmem:[#allocation5] sm:$0xff]  ;;  %vm89_vm0 = vcmask 261120   ;;  %s304_s11 = smov [#allocation8]  }
   0xf   :  { %99 = vmatpush.bf16.msra.mxu0 %v184_v0  ;;  %v67_v2 = vld [vmem:[#allocation2] sm:$0x3]  ;;  %v185_v5 = vld [vmem:[#allocation7] sm:$0xff]  ;;  %s152_s12 = sshll.u32 %s304_s11, 4  ;;  %s154_s15 = sshll.u32 %s358_s5, 4  ;;  %s153_s12 = int_to_ptr.vmem [resolvable:$true] %s152_s12  ;;  %s155_s15 = int_to_ptr.hbm [resolvable:$true] %s154_s15 }
  0x10   :  { %v68_v3 = vpack.c.bf16 %v67_v2, %v67_v2  ;;  %v186_v4 = vld [vmem:[#allocation7 + $0x8] sm:$0xff] }
  0x11   :  { %139 = vmatpush.bf16.msra.mxu1 %v186_v4  ;;  %v193_v6 = vld [vmem:[%s355_s2] ss:$0 sm:$0xff] }
  0x12   :  { %v194_v14 = vld [vmem:[%s357_s4] ss:$0 sm:$0xff] }
  0x13   :  { %100 = vmatpush.bf16.msra.mxu0 %v183_v1 }
  0x15   :  { %140 = vmatpush.bf16.msra.mxu1 %v185_v5 }
  0x16   :  { %173 = vmatmul.msk.bf16.vlgmr.msra.gmra.mxu0 %vm89_vm0, %v68_v3 }
  0x93   :  { %v102_v7 = vpop.f32.mrf.mxu0 }
  0x94   :  { %v103_v8 = vadd.f32 %v193_v6, %v102_v7 }
  0x96   :  { %v106_v9 = vpack.c.bf16 %v103_v8, %v103_v8 }
  0x98   :  { %v107_v10 = vunpack.c.l.bf16 %v106_v9 }
  0x9a   :  { %195 = vtanh.f32 %v107_v10 }
  0x9b   :  { %v104_v11 = vpop.f32.mrf.mxu0 }
  0xa0   :  { %v196_v12 = vpop.eup %195 }
  0xa1   :  { %v109_v13 = vpack.c.bf16 %v196_v12, %v196_v12 }
  0xa3   :  { %182 = vmatmul.msk.bf16.vlgmr.msra.gmra.mxu1 %vm89_vm0, %v109_v13 }
 0x120   :  { %v142_v15 = vpop.f32.mrf.mxu1 }
 0x121   :  { %v143_v16 = vadd.f32 %v194_v14, %v142_v15 }
 0x123   :  { %146 = vst [vmem:[#allocation8] sm:$0x3] %v143_v16 }
 0x124   :  { %157 = dma.vmem_to_hbm [thread:$0]  %s153_s12, 32, %s155_s15, [#allocation4]  }
 0x128   :  { %v144_v17 = vpop.f32.mrf.mxu1 }
 0x129   :  { %297 = dma.done.wait [#allocation4], 32  }
 0x12a   :  { %298 = vsyncadd [#allocation4], 4294967264 }
 0x12b   :  { %162 = vsyncpa [#allocation3], 1 }
 0x12c   :  { %163 = vsyncpa [#allocation6], 1 }
 0x12d   :  { %164 = vsyncpa [#allocation4], 1 }

</bundles_post_ra>
